<compile_context>
chip_gen: v7x
topology: tpu7x:2x2x1
jax: 0.10.0
libtpu: 0.0.40
codegen_flags: <defaults>
</compile_context>

<pallas_src>
import jax
import jax.numpy as jnp
from jax import lax
from jax.experimental import pallas as pl
from jax.experimental.pallas import tpu as pltpu


_CONTRACT_LAST_FIRST = (((1,), (0,)), ((), ()))   # contract lhs dim 1 with rhs dim 0
_CONTRACT_FIRST_FIRST = (((0,), (0,)), ((), ()))  # contract lhs dim 0 with rhs dim 0


def _make_kernel(dk, dv, tq, compute_dtype, self_attn):
    """Builds the attention kernel body.

    Refs (self-attention):  xf, wq, wk, wv, out, k_sc, v_sc
    Refs (cross-attention): xf, yf, wq, wk, wv, out, k_sc, v_sc
      xf  : (1, din, hw)  full spatial block of x (resident across query tiles)
      yf  : (1, din, hw)  full spatial block of y (V source, cross-attn only)
      wq  : (dk, din)     wk: (dk, din)   wv: (dv, din)
      out : (1, dv, tq)   Z^T tile (lane-dense along the query axis)
      k_sc: (dk, hw)      v_sc: (dv, hw)  persistent per-batch K^T / V^T
    """
    cdt = compute_dtype
    exact_recip = (cdt == jnp.float32)

    def kernel(*refs):
        if self_attn:
            xf_ref, wq_ref, wk_ref, wv_ref, o_ref, k_sc, v_sc = refs
            yf_ref = None
        else:
            xf_ref, yf_ref, wq_ref, wk_ref, wv_ref, o_ref, k_sc, v_sc = refs

        qi = pl.program_id(1)

        # Hoisted K/V projections: once per batch, kept in persistent VMEM
        # scratch across all query tiles of that batch (qi axis is "arbitrary").
        @pl.when(qi == 0)
        def _():
            x_all = xf_ref[0]                                         # (din, hw)
            k_sc[...] = lax.dot_general(wk_ref[...], x_all,
                                        _CONTRACT_LAST_FIRST,
                                        preferred_element_type=cdt)   # (dk, hw)
            y_all = x_all if self_attn else yf_ref[0]
            v_sc[...] = lax.dot_general(wv_ref[...], y_all,
                                        _CONTRACT_LAST_FIRST,
                                        preferred_element_type=cdt)   # (dv, hw)

        # Query tile sliced from the resident full-x block (no second x DMA).
        if tq % 128 == 0:
            q_start = pl.multiple_of(qi * tq, 128)
        else:
            q_start = qi * tq
        x_q = xf_ref[0, :, pl.ds(q_start, tq)]                        # (din, tq)
        q_t = lax.dot_general(wq_ref[...], x_q, _CONTRACT_LAST_FIRST,
                              preferred_element_type=cdt)             # (dk, tq)

        # Transposed scores S^T[k_pos, q_pos]; f32 accumulation on the MXU.
        # (The PyTorch module applies no 1/sqrt(dk) scale, so neither do we.)
        s_t = lax.dot_general(k_sc[...], q_t, _CONTRACT_FIRST_FIRST,
                              preferred_element_type=jnp.float32)     # (hw, tq)

        # Softmax over keys (axis 0) in f32; normalization deferred past PV.
        m = jnp.max(s_t, axis=0, keepdims=True)                       # (1, tq)
        p = jnp.exp(s_t - m)                                          # (hw, tq)
        l = jnp.sum(p, axis=0, keepdims=True)                         # (1, tq)

        # Z^T tile: V^T(dv,hw) @ P^T(hw,tq) -> (dv, tq).
        z_t = lax.dot_general(v_sc[...], p.astype(cdt),
                              _CONTRACT_LAST_FIRST,
                              preferred_element_type=jnp.float32)     # (dv, tq)

        if exact_recip:
            inv_l = 1.0 / l                     # bit-faithful f32 path
        else:
            inv_l = pl.reciprocal(l, approx=True)   # EUP slot, off the VALU path
        o_ref[0] = (z_t * inv_l).astype(o_ref.dtype)

    return kernel


def _tpu_vmem_capacity_bytes():
    """Per-core VMEM capacity; conservative 64 MiB (v7x) fallback."""
    try:
        return int(pltpu.get_tpu_info().vmem_capacity_bytes)
    except Exception:
        return 64 * 1024 * 1024


def _pick_tq(hw, score_budget_bytes):
    """Largest 128-multiple query tile whose two (hw, tq) f32 blocks fit budget."""
    if hw % 128 != 0:
        # TODO(synk): pad hw to a lane multiple for large unaligned inputs
        # instead of falling back to a single unblocked query tile.
        return hw
    best = 128
    for cand in (256, 512, 1024):
        if hw % cand == 0 and 2 * hw * cand * 4 <= score_budget_bytes:
            best = cand
    return best


def _vmem_limit_bytes(din, dk, dv, hw, tq, esize, self_attn, vmem_cap):
    n_spatial = 1 if self_attn else 2
    est = (
        n_spatial * 2 * din * hw * esize       # resident x (and y), double-buffered
        + 2 * (2 * dk + dv) * din * esize      # weights, double-buffered (tiny)
        + 2 * dv * tq * 4                      # output tile (f32), double-buffered
        + (dk + dv) * hw * esize               # persistent K/V scratch
        + 2 * hw * tq * 4                      # scores + exp(p), f32
        + hw * tq * esize                      # p cast feeding the PV matmul
        + (dk + dv) * tq * 4                   # q_t / z_t temporaries
    )
    limit = int(1.5 * est) + (4 << 20)
    # Generation-aware: up to ~96 MiB on v5e/v6e (128 MiB VMEM), ~48 MiB on v7x.
    return max(16 << 20, min(limit, (3 * vmem_cap) // 4))


def basic_attention(x_nchw, wq, wk, wv, y_nchw=None, *, tq=None,
                    compute_dtype=jnp.bfloat16):
    """x_nchw: (b, din, h, w).  wq/wk: (dk, din, 1, 1).  wv: (dv, din, 1, 1).

    Returns (b, dv, h, w) float32, matching BasicAttention.forward.
    """
    b, din, h, w = x_nchw.shape
    dk = wq.shape[0]
    dv = wv.shape[0]
    hw = h * w
    self_attn = y_nchw is None
    if not self_attn:
        assert y_nchw.shape == (b, din, h, w)

    cdt = jnp.dtype(compute_dtype)
    esize = cdt.itemsize

    # Cast operands to the MXU compute dtype at rest (halves HBM DMA + resident
    # VMEM for bf16) and flatten spatial dims; channels stay major so hw is the
    # lane-dense minor axis end-to-end (input and output).  Free reshapes only.
    x_flat = x_nchw.reshape(b, din, hw).astype(cdt)
    wq_m = wq[:, :, 0, 0].astype(cdt)                    # (dk, din)
    wk_m = wk[:, :, 0, 0].astype(cdt)                    # (dk, din)
    wv_m = wv[:, :, 0, 0].astype(cdt)                    # (dv, din)

    vmem_cap = _tpu_vmem_capacity_bytes()
    if tq is None:
        tq = _pick_tq(hw, score_budget_bytes=vmem_cap // 8)
    assert hw % tq == 0 and (tq % 128 == 0 or tq == hw)
    n_q = hw // tq

    x_full_spec = pl.BlockSpec((1, din, hw), lambda bi, qi: (bi, 0, 0))
    wq_spec = pl.BlockSpec((dk, din), lambda bi, qi: (0, 0))
    wk_spec = pl.BlockSpec((dk, din), lambda bi, qi: (0, 0))
    wv_spec = pl.BlockSpec((dv, din), lambda bi, qi: (0, 0))
    out_spec = pl.BlockSpec((1, dv, tq), lambda bi, qi: (bi, 0, qi))

    if self_attn:
        in_specs = [x_full_spec, wq_spec, wk_spec, wv_spec]
        args = (x_flat, wq_m, wk_m, wv_m)
    else:
        y_flat = y_nchw.reshape(b, din, hw).astype(cdt)
        in_specs = [x_full_spec, x_full_spec, wq_spec, wk_spec, wv_spec]
        args = (x_flat, y_flat, wq_m, wk_m, wv_m)

    out = pl.pallas_call(
        _make_kernel(dk, dv, tq, cdt, self_attn),
        out_shape=jax.ShapeDtypeStruct((b, dv, hw), jnp.float32),
        grid=(b, n_q),
        in_specs=in_specs,
        out_specs=out_spec,
        scratch_shapes=[pltpu.VMEM((dk, hw), cdt),     # persistent K^T
                        pltpu.VMEM((dv, hw), cdt)],    # persistent V^T
        compiler_params=pltpu.CompilerParams(
            # Batch axis "parallel" (sharded across v7x's 2 TCs); the query-tile
            # axis must be "arbitrary" because the K/V scratch persists across it.
            dimension_semantics=("parallel", "arbitrary"),
            vmem_limit_bytes=_vmem_limit_bytes(din, dk, dv, hw, tq, esize,
                                               self_attn, vmem_cap)),
    )(*args)

    # Output is already (b, dv, hw) -> NCHW via a free reshape (no transpose).
    return out.reshape(b, dv, h, w)


def _reference(x_nchw, wq, wk, wv, y_nchw=None):
    """Pure-JAX f32 reference mirroring the PyTorch forward (V from y)."""
    if y_nchw is None:
        y_nchw = x_nchw
    b, din, h, w = x_nchw.shape
    dv = wv.shape[0]
    hw = h * w
    xf = x_nchw.reshape(b, din, hw)
    yf = y_nchw.reshape(b, din, hw)
    Q = jnp.einsum('kd,bdp->bkp', wq[:, :, 0, 0], xf)     # (b, dk, hw)
    K = jnp.einsum('kd,bdp->bkp', wk[:, :, 0, 0], xf)
    V = jnp.einsum('vd,bdp->bvp', wv[:, :, 0, 0], yf)     # (b, dv, hw)
    S = jnp.einsum('bkq,bkp->bqp', Q, K)                  # (b, hw_q, hw_k)
    P = jax.nn.softmax(S, axis=-1)
    Z = jnp.einsum('bqp,bvp->bvq', P, V)                  # (b, dv, hw)
    return Z.reshape(b, dv, h, w)


if __name__ == "__main__":
    B, DIN, DK, DV, H, W = 2, 4, 8, 8, 16, 16

    key = jax.random.PRNGKey(0)
    kx, ky, kq, kk, kv = jax.random.split(key, 5)

    x = jax.random.normal(kx, (B, DIN, H, W), dtype=jnp.float32)
    y = jax.random.normal(ky, (B, DIN, H, W), dtype=jnp.float32)
    # deterministic synthetic conv weights, shapes match nn.Conv2d(din, out, 1, bias=False)
    wq = jax.random.normal(kq, (DK, DIN, 1, 1), dtype=jnp.float32) * 0.1
    wk = jax.random.normal(kk, (DK, DIN, 1, 1), dtype=jnp.float32) * 0.1
    wv = jax.random.normal(kv, (DV, DIN, 1, 1), dtype=jnp.float32) * 0.1

    z_ref = _reference(x, wq, wk, wv)

    # 1) self-attention, f32 MXU operands, tq=128 so the query-tile axis and the
    #    per-batch persistent-KV scratch are both exercised.
    z32 = jax.block_until_ready(
        basic_attention(x, wq, wk, wv, tq=128, compute_dtype=jnp.float32))
    assert z32.shape == (B, DV, H, W)
    assert jnp.allclose(z32, z_ref, atol=2e-4, rtol=1e-3), \
        float(jnp.max(jnp.abs(z32 - z_ref)))

    # 2) self-attention, default bf16 MXU operands + f32 accumulation, tq=128.
    zbf = jax.block_until_ready(basic_attention(x, wq, wk, wv, tq=128))
    assert zbf.shape == (B, DV, H, W)
    assert jnp.allclose(zbf, z_ref, atol=5e-3, rtol=5e-2), \
        float(jnp.max(jnp.abs(zbf - z_ref)))

    # 3) cross-attention (V computed from y), f32, auto tile size.
    zc = jax.block_until_ready(
        basic_attention(x, wq, wk, wv, y_nchw=y, compute_dtype=jnp.float32))
    zc_ref = _reference(x, wq, wk, wv, y)
    assert jnp.allclose(zc, zc_ref, atol=2e-4, rtol=1e-3), \
        float(jnp.max(jnp.abs(zc - zc_ref)))

    print("KERNEL_OK")
</pallas_src>

<mosaic_0001>
module attributes {stable_mosaic.version = 11 : i64} {
  func.func @kernel(%arg0: i32, %arg1: i32, %arg2: memref<1x4x256xf32, #tpu.memory_space<vmem>>, %arg3: memref<8x4xf32, #tpu.memory_space<vmem>>, %arg4: memref<8x4xf32, #tpu.memory_space<vmem>>, %arg5: memref<8x4xf32, #tpu.memory_space<vmem>>, %arg6: memref<1x8x128xf32, #tpu.memory_space<vmem>>, %arg7: memref<8x256xf32, #tpu.memory_space<vmem>>, %arg8: memref<8x256xf32, #tpu.memory_space<vmem>>) attributes {dimension_semantics = [#tpu.dimension_semantics<parallel>, #tpu.dimension_semantics<arbitrary>], iteration_bounds = array<i64: 2, 2>, scalar_prefetch = 0 : i64, scratch_operands = 2 : i64, tpu.core_type = #tpu.core_type<tc>, window_params = [{transform_indices = @transform_0, window_bounds = array<i64: 1, 4, 256>}, {pipeline_mode = #tpu.pipeline_mode<synchronous>, transform_indices = @transform_1, window_bounds = array<i64: 8, 4>}, {pipeline_mode = #tpu.pipeline_mode<synchronous>, transform_indices = @transform_2, window_bounds = array<i64: 8, 4>}, {pipeline_mode = #tpu.pipeline_mode<synchronous>, transform_indices = @transform_3, window_bounds = array<i64: 8, 4>}, {transform_indices = @transform_4, window_bounds = array<i64: 1, 8, 128>}]} {
    %c0_i32 = arith.constant 0 : i32
    %0 = arith.cmpi eq, %arg1, %c0_i32 : i32
    %1 = arith.extui %0 : i1 to i32
    %c0_i32_0 = arith.constant 0 : i32
    %2 = arith.cmpi ne, %1, %c0_i32_0 : i32
    scf.if %2 {
      %c0_16 = arith.constant 0 : index
      %c0_17 = arith.constant 0 : index
      %c0_18 = arith.constant 0 : index
      %28 = vector.load %arg2[%c0_16, %c0_17, %c0_18] : memref<1x4x256xf32, #tpu.memory_space<vmem>>, vector<1x4x256xf32>
      %29 = vector.shape_cast %28 : vector<1x4x256xf32> to vector<4x256xf32>
      %c0_19 = arith.constant 0 : index
      %c0_20 = arith.constant 0 : index
      %30 = vector.load %arg4[%c0_19, %c0_20] : memref<8x4xf32, #tpu.memory_space<vmem>>, vector<8x4xf32>
      %cst_21 = arith.constant dense<0.000000e+00> : vector<8x256xf32>
      %31 = tpu.matmul %30, %29, %cst_21 {dimension_numbers = #tpu.dot_dimension_numbers<[1], [0], [0], [1], [0, 0, 1, 1], [], []>} : vector<8x4xf32>, vector<4x256xf32>, vector<8x256xf32> -> vector<8x256xf32>
      %c0_22 = arith.constant 0 : index
      %c0_23 = arith.constant 0 : index
      %32 = vector.load %arg7[%c0_22, %c0_23] : memref<8x256xf32, #tpu.memory_space<vmem>>, vector<8x256xf32>
      tpu.vector_store %arg7[%c0_22, %c0_23], %31 {strides = array<i32>} : memref<8x256xf32, #tpu.memory_space<vmem>>, vector<8x256xf32>,
      %c0_24 = arith.constant 0 : index
      %c0_25 = arith.constant 0 : index
      %33 = vector.load %arg5[%c0_24, %c0_25] : memref<8x4xf32, #tpu.memory_space<vmem>>, vector<8x4xf32>
      %cst_26 = arith.constant dense<0.000000e+00> : vector<8x256xf32>
      %34 = tpu.matmul %33, %29, %cst_26 {dimension_numbers = #tpu.dot_dimension_numbers<[1], [0], [0], [1], [0, 0, 1, 1], [], []>} : vector<8x4xf32>, vector<4x256xf32>, vector<8x256xf32> -> vector<8x256xf32>
      %c0_27 = arith.constant 0 : index
      %c0_28 = arith.constant 0 : index
      %35 = vector.load %arg8[%c0_27, %c0_28] : memref<8x256xf32, #tpu.memory_space<vmem>>, vector<8x256xf32>
      tpu.vector_store %arg8[%c0_27, %c0_28], %34 {strides = array<i32>} : memref<8x256xf32, #tpu.memory_space<vmem>>, vector<8x256xf32>,
    } else {
    }
    %c128_i32 = arith.constant 128 : i32
    %3 = arith.muli %arg1, %c128_i32 : i32
    %4 = tpu.assume_multiple %3, 128 : i32
    %c0 = arith.constant 0 : index
    %c0_1 = arith.constant 0 : index
    %5 = arith.index_cast %4 : i32 to index
    %6 = vector.load %arg2[%c0, %c0_1, %5] : memref<1x4x256xf32, #tpu.memory_space<vmem>>, vector<1x4x128xf32>
    %7 = vector.shape_cast %6 : vector<1x4x128xf32> to vector<4x128xf32>
    %c0_2 = arith.constant 0 : index
    %c0_3 = arith.constant 0 : index
    %8 = vector.load %arg3[%c0_2, %c0_3] : memref<8x4xf32, #tpu.memory_space<vmem>>, vector<8x4xf32>
    %cst = arith.constant dense<0.000000e+00> : vector<8x128xf32>
    %9 = tpu.matmul %8, %7, %cst {dimension_numbers = #tpu.dot_dimension_numbers<[1], [0], [0], [1], [0, 0, 1, 1], [], []>} : vector<8x4xf32>, vector<4x128xf32>, vector<8x128xf32> -> vector<8x128xf32>
    %c0_4 = arith.constant 0 : index
    %c0_5 = arith.constant 0 : index
    %10 = vector.load %arg7[%c0_4, %c0_5] : memref<8x256xf32, #tpu.memory_space<vmem>>, vector<8x256xf32>
    %cst_6 = arith.constant dense<0.000000e+00> : vector<256x128xf32>
    %11 = tpu.matmul %10, %9, %cst_6 {dimension_numbers = #tpu.dot_dimension_numbers<[0], [0], [1], [1], [0, 1, 1, 1], [], []>} : vector<8x256xf32>, vector<8x128xf32>, vector<256x128xf32> -> vector<256x128xf32>
    %cst_7 = arith.constant dense<0xFF800000> : vector<128xf32>
    %12 = vector.multi_reduction <maximumf>, %11, %cst_7 [0] : vector<256x128xf32> to vector<128xf32>
    %13 = vector.shape_cast %12 : vector<128xf32> to vector<1x128xf32>
    %14 = vector.broadcast %13 : vector<1x128xf32> to vector<256x128xf32>
    %15 = arith.subf %11, %14 : vector<256x128xf32>
    %16 = math.exp %15 : vector<256x128xf32>
    %cst_8 = arith.constant dense<0.000000e+00> : vector<128xf32>
    %17 = vector.multi_reduction <add>, %16, %cst_8 [0] : vector<256x128xf32> to vector<128xf32>
    %18 = vector.shape_cast %17 : vector<128xf32> to vector<1x128xf32>
    %c0_9 = arith.constant 0 : index
    %c0_10 = arith.constant 0 : index
    %19 = vector.load %arg8[%c0_9, %c0_10] : memref<8x256xf32, #tpu.memory_space<vmem>>, vector<8x256xf32>
    %cst_11 = arith.constant dense<0.000000e+00> : vector<8x128xf32>
    %20 = tpu.matmul %19, %16, %cst_11 {dimension_numbers = #tpu.dot_dimension_numbers<[1], [0], [0], [1], [0, 0, 1, 1], [], []>} : vector<8x256xf32>, vector<256x128xf32>, vector<8x128xf32> -> vector<8x128xf32>
    %cst_12 = arith.constant 1.000000e+00 : f32
    %21 = vector.broadcast %cst_12 : f32 to vector<1x128xf32>
    %22 = arith.divf %21, %18 : vector<1x128xf32>
    %23 = vector.broadcast %22 : vector<1x128xf32> to vector<8x128xf32>
    %24 = arith.mulf %20, %23 : vector<8x128xf32>
    %c0_13 = arith.constant 0 : index
    %c0_14 = arith.constant 0 : index
    %c0_15 = arith.constant 0 : index
    %25 = vector.load %arg6[%c0_13, %c0_14, %c0_15] : memref<1x8x128xf32, #tpu.memory_space<vmem>>, vector<1x8x128xf32>
    %26 = vector.shape_cast %25 : vector<1x8x128xf32> to vector<8x128xf32>
    %27 = vector.shape_cast %24 : vector<8x128xf32> to vector<1x8x128xf32>
    tpu.vector_store %arg6[%c0_13, %c0_14, %c0_15], %27 {strides = array<i32>} : memref<1x8x128xf32, #tpu.memory_space<vmem>>, vector<1x8x128xf32>,
    return
  }
  func.func @transform_0(%arg0: i32, %arg1: i32) -> (i32, i32, i32) {
    %c0_i32 = arith.constant 0 : i32
    %c0_i32_0 = arith.constant 0 : i32
    %c0_i32_1 = arith.constant 0 : i32
    return %arg0, %c0_i32, %c0_i32_0 : i32, i32, i32
  }
  func.func @transform_1(%arg0: i32, %arg1: i32) -> (i32, i32) {
    %c0_i32 = arith.constant 0 : i32
    %c0_i32_0 = arith.constant 0 : i32
    %c0_i32_1 = arith.constant 0 : i32
    return %c0_i32, %c0_i32_0 : i32, i32
  }
  func.func @transform_2(%arg0: i32, %arg1: i32) -> (i32, i32) {
    %c0_i32 = arith.constant 0 : i32
    %c0_i32_0 = arith.constant 0 : i32
    %c0_i32_1 = arith.constant 0 : i32
    return %c0_i32, %c0_i32_0 : i32, i32
  }
  func.func @transform_3(%arg0: i32, %arg1: i32) -> (i32, i32) {
    %c0_i32 = arith.constant 0 : i32
    %c0_i32_0 = arith.constant 0 : i32
    %c0_i32_1 = arith.constant 0 : i32
    return %c0_i32, %c0_i32_0 : i32, i32
  }
  func.func @transform_4(%arg0: i32, %arg1: i32) -> (i32, i32, i32) {
    %c0_i32 = arith.constant 0 : i32
    %c0_i32_0 = arith.constant 0 : i32
    return %arg0, %c0_i32, %arg1 : i32, i32, i32
  }
}

</mosaic_0001>

<bundles_post_ra>
// kernel: tpu_custom_call.1
= control target key start
LH: loop header
LB: loop body
LE: loop exit
PB: predicated region body
PF: predicated region fallthrough
CT: control target
= control target key end

     0   :  { %9 = vsyncpa [#allocation5], 0  ;;  %s2139_s0 = inlined_call_operand.vmem [shape: f32[2,4,256], index: 0, kind: input, shape index: {}]   ;;  %s2140_s1 = inlined_call_operand.vmem [shape: f32[8,4], index: 1, kind: input, shape index: {}]   ;;  %s2141_s2 = inlined_call_operand.vmem [shape: f32[8,4], index: 2, kind: input, shape index: {}]   ;;  %s2142_s3 = inlined_call_operand.vmem [shape: f32[8,4], index: 3, kind: input, shape index: {}]   ;;  %s2143_s4 = inlined_call_operand.hbm [shape: f32[2,8,256], index: 4, kind: output, shape index: {}]  }
   0x1   :  { %11 = vsyncpa [#allocation5 + $0x1], 0  ;;  %s1666_s15 = smov 0   ;;  %s1668_s16 = smov 0  }
   0x2   :  { %s1670_s17 = smov 0   ;;  %s1672_s18 = smov 0  }
   0x3   :  { %s1674_s19 = smov 0   ;;  %s1676_s20 = smov 0  }
   0x4   :  { %s1678_s21 = smov 0   ;;  %s1680_s22 = smov 0  }
   0x5 LB: > { %s1186_s23 = sadd.s32 4294967295, %s1635_s22   ;;  %s1187_s24 = sadd.s32 4294967294, %s1635_s22   ;;  %s1635_s22 = sphi %s1680_s22, %s17_s22   ;;  %s1631_s21 = sphi %s1678_s21, %s2152_s21   ;;  %s1627_s20 = sphi %s1676_s20, %s2151_s20   ;;  %s1623_s19 = sphi %s1674_s19, %s2150_s19   ;;  %s1619_s18 = sphi %s1672_s18, %s2149_s18   ;;  %s1615_s17 = sphi %s1670_s17, %s2148_s17   ;;  %s1611_s16 = sphi %s1668_s16, %s2147_s16   ;;  %s1607_s15 = sphi %s1666_s15, %s2146_s15  }
   0x6   : > { %s26_s25 = sadd.s32 1, %s1627_s20  ;;  %s29_s26 = sadd.s32 1, %s1631_s21 }
   0x7   : > { %p27_p0 = scmp.ge.s32.totalorder %s26_s25, 2  ;;  %p137_p1 = scmp.ne.s32.totalorder %s1615_s17, %s1611_s16 }
   0x8   : > { %p138_p2 = scmp.eq.s32.totalorder %s1186_s23, 3  ;;  %p143_p5 = scmp.ne.s32.totalorder %s1611_s16, %s1607_s15 }
   0x9   : > { %s2154_s25 = smov (%p27_p0, %s26_s25), 0  ;;  %s2156_s26 = smov (!%p27_p0, %s29_s26), %s1631_s21 }
   0xa   : > { %s123_s27 = ssub.s32 %s1627_s20, %s2154_s25  ;;  %p1717_p3 = por %p138_p2, %p137_p1 }
   0xb   : > { %p31_p4 = scmp.ge.s32.totalorder %s2156_s26, 2  ;;  %p144_p6 = scmp.eq.s32.totalorder %s1187_s24, 3 }
   0xc   : > { %p1190_p7 = scmp.ge.s32.totalorder %s1635_s22, 1  ;;  %p179_p9 = scmp.lt.s32.totalorder %s1635_s22, 5 }
   0xd   : > { %s2158_s26 = smov (%p31_p4, %s2156_s26), 0  ;;  %p1726_p8 = por %p144_p6, %p143_p5 }
   0xe   : > { %s122_s30 = ssub.s32 %s1631_s21, %s2158_s26  ;;  %s127_s5 = sadd.s32 1, %s1615_s17 }
   0xf   : > { %s124_s6 = sor.u32 %s123_s27, %s122_s30  ;;  %p180_p10 = pnand %p1190_p7, %p179_p9 }
  0x10   : > { %p125_p11 = scmp.eq.s32.totalorder %s124_s6, 0  ;;  %s202_s8 = sand.u32 (!%p180_p10), 1, %s1611_s16  }
  0x11   : > { %183 = sbr.rel (%p180_p10) target bundleno = 1061 (0x425), region = 36  ;;  %p205_p12 = scmp.lt.s32.totalorder (!%p180_p10), %s1623_s19, 1 }
  0x12   : > { %s1735_s7 = scalar_select %p125_p11, %s1615_s17, %s127_s5  }
  0x13   : > { %s1741_s9 = sshll.u32 (!%p180_p10), %s202_s8, 3  ;;  %p1194_p13 = scmp.ne.s32.totalorder (!%p180_p10), %s1619_s18, 0 }
  0x14   : > { %s204_s23 = scalar_lea.vmem (!%p180_p10), [#allocation4], %s1741_s9 }
  0x18   : > { %s206_s10 = scalar_select %p205_p12, %s1623_s19, 1 }
  0x19   : > { %213 = sbr.rel (%p1194_p13) target bundleno = 247 (0xf7), region = 40  ;;  %vm222_vm0 = vcmask (!%p1194_p13), 1043456   ;;  %v1637_v2 = vmov (!%p1194_p13), 0.0   ;;  %v215_v3 = vld [vmem:[%s2141_s2] sm:$0xff] (!%p1194_p13)  ;;  %vm218_vm1 = vcmask (!%p1194_p13), 31744  }
  0x1a   : > { %s1242_s11 = sshll.u32 %s206_s10, 3  ;;  %291 = vmatprep.mubr.f32.mxu0 (!%p1194_p13), %v1637_v2  ;;  %368 = vmatprep.mubr.f32.mxu1 (!%p1194_p13), %v1637_v2  ;;  %v300_v4 = vld [vmem:[%s2142_s3] sm:$0xff] (!%p1194_p13) }
  0x1b   : > { %s1747_s14 = scalar_lea.vmem %s2139_s0, %s1242_s11 }
  0x1c   : > { %v214_v0 = vld [vmem:[%s1747_s14] sm:$0xff] (!%p1194_p13) }
  0x1d   : > { %v217_v1 = vcombine.high (!%p1194_p13), %v214_v0, %v214_v0 }
  0x1f   : > { %1195 = vmatprep.subr.msk.mxu0 (!%p1194_p13), %vm222_vm0, %v217_v1  ;;  %1198 = vmatprep.subr.msk.mxu1 (!%p1194_p13), %vm222_vm0, %v217_v1 }
  0x20   : > { %1196 = vmatpush1.msk.msra.mxu0 %vm222_vm0, %v214_v0  ;;  %1199 = vmatpush1.msk.msra.mxu1 %vm222_vm0, %v214_v0 }
  0x21   : > { %1197 = vmatmul.mubr.msk.f32.vlgmr.msra.gmra.mrb[0].mxu0 %vm218_vm1, %v215_v3  ;;  %1200 = vmatmul.mubr.msk.f32.vlgmr.msra.gmra.mrb[0].mxu1 %vm218_vm1, %v300_v4 }
  0xf4   : > { %v293_v5 = vpop.f32.mrb[0].mxu0  ;;  %v370_v6 = vpop.f32.mrb[0].mxu1 }
  0xf5   : > { %298 = vst [vmem:[#allocation2] sm:$0xff] %v293_v5  ;;  %375 = vst [vmem:[#allocation3] sm:$0xff] %v370_v6  ;;  %v295_v7 = vpop.f32.mrb[1].mxu0  ;;  %v372_v8 = vpop.f32.mrb[1].mxu1 }
  0xf6   : > { %299 = vst [vmem:[#allocation2 + $0x8] sm:$0xff] %v295_v7  ;;  %376 = vst [vmem:[#allocation3 + $0x8] sm:$0xff] %v372_v8 }
  0xf7 PF: > { %s1201_s6 = sshll.u32 %s1619_s18, 7  ;;  %v1638_v9 = vmov 0.0   ;;  %vm1639_vm2 = vmmov 0   ;;  %vm388_vm3 = vcmask 1043456   ;;  %v383_v11 = vld [vmem:[%s2140_s1] sm:$0xff]  ;;  %vm384_vm4 = vcmask 31744  }
  0xf8   : > { %1313 = vmatprep.subr.mxu0 %v1638_v9  ;;  %s378_s10 = sshra.s32 %s1201_s6, 7  ;;  %1315 = vmatprep.mubr.msk.f32.mxu0 %vm1639_vm2, %v1638_v9  ;;  %vm528_vm5 = vcmask 64512   ;;  %s1112_s5 = sshll.u32 %s204_s23, 4  ;;  %s2084_s5 = int_to_ptr.vmem [resolvable:$true] %s1112_s5 }
  0xf9   : > { %s1202_s11 = sshll.u32 %s378_s10, 2 }
  0xfa   : > { %s381_s12 = scalar_lea.vmem %s1747_s14, %s1202_s11  ;;  %s1238_s14 = sshll.u32 %s1623_s19, 1 }
  0xfb   : > { %v382_v12 = vld [vmem:[%s381_s12] sm:$0xf]  ;;  %s1108_s27 = sadd.s32 %s1619_s18, %s1238_s14  ;;  %s1097_s18 = scalar_lea.sflag [#allocation5], %s202_s8 }
  0xfc   : > { %v462_v10 = vld [vmem:[#allocation2] sm:$0xff]  ;;  %1314 = vmatpush3.msk.msra.mxu0 %vm388_vm3, %v382_v12  ;;  %s1239_s30 = sshll.u32 %s1108_s27, 7  ;;  %s1541_s19 = scalar_lea.vmem %s2084_s5, 128 }
  0xfd   : > { %464 = vxpose.xlu0.b32.start.end [1/1] (short) %v462_v10, 128  ;;  %1316 = vmatmul.mubr.msk.f32.vlgmr.msra.gmra.mrb[0].mxu0 %vm384_vm4, %v383_v11  ;;  %v463_v13 = vld [vmem:[#allocation2 + $0x8] sm:$0xff]  ;;  %s2082_s11 = scalar_lea.hbm %s2143_s4, %s1239_s30  ;;  %p1542_p0 = scmp.ne.s32.totalorder %s2084_s5, %s1541_s19 }
  0xfe   : > { %s1640_s12 = smov [#allocation4]  }
  0xff   : > { %p1543_p1 = pnand %p1542_p0, %p1717_p3  ;;  %s1545_s13 = sshll.u32 %s1640_s12, 4  ;;  %s1546_s13 = int_to_ptr.vmem [resolvable:$false] %s1545_s13 }
 0x100   : > { %s1547_s24 = scalar_lea.vmem %s1546_s13, 256  ;;  %p1548_p4 = scmp.lt.s32.totalorder %s2084_s5, %s1546_s13 }
 0x101   : > { %p1544_p2 = pneg %p1543_p1  ;;  %p1549_p5 = scmp.lt.s32.totalorder %s1547_s24, %s1541_s19 }
 0x103   : > { %p1550_p6 = por %p1549_p5, %p1548_p4 }
 0x105   : > { %p1551_p7 = pnand %p1550_p6, %p1544_p2 }
 0x13a   : > { %496 = vxpose.xlu0.b32.start.end [1/1] (short) %v463_v13, 128 }
 0x17d   : > { %v480_v14 = vpop.trf.xlu0 }
 0x17e   : > { %1320 = vmatprep.mubr.msk.f32.mxu1 %vm528_vm5, %v480_v14 }
 0x181   : > { %v481_v15 = vpop.trf.xlu0 }
 0x185   : > { %v482_v16 = vpop.trf.xlu0 }
 0x189   : > { %v483_v17 = vpop.trf.xlu0 }
 0x18d   : > { %v484_v18 = vpop.trf.xlu0 }
 0x191   : > { %v485_v19 = vpop.trf.xlu0 }
 0x195   : > { %v486_v20 = vpop.trf.xlu0 }
 0x199   : > { %v487_v21 = vpop.trf.xlu0 }
 0x19d   : > { %v488_v22 = vpop.trf.xlu0 }
 0x1a1   : > { %v489_v23 = vpop.trf.xlu0 }
 0x1a5   : > { %v490_v24 = vpop.trf.xlu0 }
 0x1a9   : > { %v491_v25 = vpop.trf.xlu0 }
 0x1ad   : > { %v492_v26 = vpop.trf.xlu0 }
 0x1b1   : > { %v493_v27 = vpop.trf.xlu0 }
 0x1b5   : > { %v494_v28 = vpop.trf.xlu0 }
 0x1b9   : > { %v495_v29 = vpop.trf.xlu0 }
 0x1bd   : > { %v512_v30 = vpop.trf.xlu0 }
 0x1c1   : > { %v513_v31 = vpop.trf.xlu0 }
 0x1c5   : > { %v514_v32 = vpop.trf.xlu0 }
 0x1c9   : > { %v515_v33 = vpop.trf.xlu0 }
 0x1cd   : > { %v516_v34 = vpop.trf.xlu0 }
 0x1d0   : > { %v458_v35 = vpop.f32.mrb[0].mxu0 }
 0x1d1   : > { %v517_v36 = vpop.trf.xlu0  ;;  %v1317_v37 = vpop.f32.mrb[1].mxu0  ;;  %1318 = vmatprep.subr.mxu1 %v458_v35 }
 0x1d2   : > { %1319 = vmatpush3.msra.mxu1 %v458_v35 }
 0x1d3   : > { %1321 = vmatmul.mubr.msk.f32.vlgmr.msra.gmra.mrb[0].mxu1 %vm528_vm5, %v481_v15 }
 0x1d4   : > { %1323 = vmatprep.mubr.msk.f32.mxu1 %vm528_vm5, %v482_v16 }
 0x1d5   : > { %v518_v38 = vpop.trf.xlu0 }
 0x1d7   : > { %1324 = vmatmul.mubr.msk.f32.gmra.mrb[2].mxu1 %vm528_vm5, %v483_v17  ;;  %v1021_v17 = vld [vmem:[#allocation3 + $0x8] sm:$0xff] }
 0x1d8   : > { %1326 = vmatprep.mubr.msk.f32.mxu1 %vm528_vm5, %v484_v18  ;;  %1086 = vmatprep.mubr.f32.mxu0 %v1021_v17 }
 0x1d9   : > { %v519_v39 = vpop.trf.xlu0 }
 0x1db   : > { %1327 = vmatmul.mubr.msk.f32.gmra.mrb[4].mxu1 %vm528_vm5, %v485_v19 }
 0x1dc   : > { %1329 = vmatprep.mubr.msk.f32.mxu1 %vm528_vm5, %v486_v20 }
 0x1dd   : > { %v520_v40 = vpop.trf.xlu0 }
 0x1df   : > { %1330 = vmatmul.mubr.msk.f32.gmra.mrb[6].mxu1 %vm528_vm5, %v487_v21 }
 0x1e0   : > { %1332 = vmatprep.mubr.msk.f32.mxu1 %vm528_vm5, %v488_v22 }
 0x1e1   : > { %v521_v41 = vpop.trf.xlu0 }
 0x1e3   : > { %1333 = vmatmul.mubr.msk.f32.gmra.mrb[8].mxu1 %vm528_vm5, %v489_v23 }
 0x1e4   : > { %1335 = vmatprep.mubr.msk.f32.mxu1 %vm528_vm5, %v490_v24 }
 0x1e5   : > { %v522_v42 = vpop.trf.xlu0 }
 0x1e7   : > { %1336 = vmatmul.mubr.msk.f32.gmra.mrb[10].mxu1 %vm528_vm5, %v491_v25 }
 0x1e8   : > { %1338 = vmatprep.mubr.msk.f32.mxu1 %vm528_vm5, %v492_v26 }
 0x1e9   : > { %v523_v43 = vpop.trf.xlu0 }
 0x1eb   : > { %1339 = vmatmul.mubr.msk.f32.gmra.mrb[12].mxu1 %vm528_vm5, %v493_v27 }
 0x1ec   : > { %1341 = vmatprep.mubr.msk.f32.mxu1 %vm528_vm5, %v494_v28 }
 0x1ed   : > { %v524_v44 = vpop.trf.xlu0 }
 0x1ef   : > { %1342 = vmatmul.mubr.msk.f32.gmra.mrb[14].mxu1 %vm528_vm5, %v495_v29 }
 0x1f0   : > { %1344 = vmatprep.mubr.msk.f32.mxu1 %vm528_vm5, %v512_v30 }
 0x1f1   : > { %v525_v45 = vpop.trf.xlu0 }
 0x1f3   : > { %1345 = vmatmul.mubr.msk.f32.gmra.mrb[16].mxu1 %vm528_vm5, %v513_v31 }
 0x1f4   : > { %1347 = vmatprep.mubr.msk.f32.mxu1 %vm528_vm5, %v514_v32 }
 0x1f5   : > { %v526_v46 = vpop.trf.xlu0 }
 0x1f7   : > { %1348 = vmatmul.mubr.msk.f32.gmra.mrb[18].mxu1 %vm528_vm5, %v515_v33 }
 0x1f8   : > { %1350 = vmatprep.mubr.msk.f32.mxu1 %vm528_vm5, %v516_v34 }
 0x1f9   : > { %v527_v47 = vpop.trf.xlu0 }
 0x1fb   : > { %1351 = vmatmul.mubr.msk.f32.gmra.mrb[20].mxu1 %vm528_vm5, %v517_v36 }
 0x1fc   : > { %1353 = vmatprep.mubr.msk.f32.mxu1 %vm528_vm5, %v518_v38 }
 0x1ff   : > { %1354 = vmatmul.mubr.msk.f32.gmra.mrb[22].mxu1 %vm528_vm5, %v519_v39 }
 0x200   : > { %1356 = vmatprep.mubr.msk.f32.mxu1 %vm528_vm5, %v520_v40 }
 0x203   : > { %1357 = vmatmul.mubr.msk.f32.gmra.mrb[24].mxu1 %vm528_vm5, %v521_v41 }
 0x204   : > { %1359 = vmatprep.mubr.msk.f32.mxu1 %vm528_vm5, %v522_v42 }
 0x207   : > { %1360 = vmatmul.mubr.msk.f32.gmra.mrb[26].mxu1 %vm528_vm5, %v523_v43 }
 0x208   : > { %1362 = vmatprep.mubr.msk.f32.mxu1 %vm528_vm5, %v524_v44 }
 0x20b   : > { %1363 = vmatmul.mubr.msk.f32.gmra.mrb[28].mxu1 %vm528_vm5, %v525_v45 }
 0x20c   : > { %1365 = vmatprep.mubr.msk.f32.mxu1 %vm528_vm5, %v526_v46 }
 0x20f   : > { %1366 = vmatmul.mubr.msk.f32.gmra.mrb[30].mxu1 %vm528_vm5, %v527_v47 }
 0x2a6   : > { %v1795_v48 = vpop.f32.mrb[0].mxu1 }
 0x2a7   : > { %v1797_v49 = vpop.f32.mrb[1].mxu1 }
 0x2aa   : > { %v1799_v50 = vpop.f32.mrb[2].mxu1 }
 0x2ab   : > { %v1801_v51 = vpop.f32.mrb[3].mxu1 }
 0x2ae   : > { %v1803_v52 = vpop.f32.mrb[4].mxu1 }
 0x2af   : > { %v851_v53 = vmax.f32 %v1795_v48, %v1803_v52  ;;  %v1807_v54 = vpop.f32.mrb[5].mxu1 }
 0x2b0   : > { %v850_v55 = vmax.f32 %v1797_v49, %v1807_v54 }
 0x2b2   : > { %v1811_v56 = vpop.f32.mrb[6].mxu1 }
 0x2b3   : > { %v853_v57 = vmax.f32 %v1799_v50, %v1811_v56  ;;  %v1815_v58 = vpop.f32.mrb[7].mxu1 }
 0x2b4   : > { %v852_v59 = vmax.f32 %v1801_v51, %v1815_v58 }
 0x2b6   : > { %v1819_v60 = vpop.f32.mrb[8].mxu1 }
 0x2b7   : > { %v855_v61 = vmax.f32 %v851_v53, %v1819_v60  ;;  %v1822_v62 = vpop.f32.mrb[9].mxu1 }
 0x2b8   : > { %v854_v63 = vmax.f32 %v850_v55, %v1822_v62 }
 0x2ba   : > { %v1825_v0 = vpop.f32.mrb[10].mxu1 }
 0x2bb   : > { %v857_v1 = vmax.f32 %v853_v57, %v1825_v0  ;;  %v1828_v2 = vpop.f32.mrb[11].mxu1 }
 0x2bc   : > { %v856_v3 = vmax.f32 %v852_v59, %v1828_v2 }
 0x2be   : > { %v1831_v4 = vpop.f32.mrb[12].mxu1 }
 0x2bf   : > { %v859_v5 = vmax.f32 %v855_v61, %v1831_v4  ;;  %v1834_v6 = vpop.f32.mrb[13].mxu1 }
 0x2c0   : > { %v858_v7 = vmax.f32 %v854_v63, %v1834_v6 }
 0x2c2   : > { %v1837_v8 = vpop.f32.mrb[14].mxu1 }
 0x2c3   : > { %v861_v9 = vmax.f32 %v857_v1, %v1837_v8  ;;  %v1840_v10 = vpop.f32.mrb[15].mxu1 }
 0x2c4   : > { %v860_v11 = vmax.f32 %v856_v3, %v1840_v10 }
 0x2c6   : > { %v1843_v12 = vpop.f32.mrb[16].mxu1 }
 0x2c7   : > { %v863_v13 = vmax.f32 %v859_v5, %v1843_v12  ;;  %v1846_v14 = vpop.f32.mrb[17].mxu1 }
 0x2c8   : > { %v862_v15 = vmax.f32 %v858_v7, %v1846_v14 }
 0x2ca   : > { %v1849_v16 = vpop.f32.mrb[18].mxu1 }
 0x2cb   : > { %v865_v18 = vmax.f32 %v861_v9, %v1849_v16  ;;  %v1852_v19 = vpop.f32.mrb[19].mxu1 }
 0x2cc   : > { %v864_v20 = vmax.f32 %v860_v11, %v1852_v19 }
 0x2ce   : > { %v1855_v21 = vpop.f32.mrb[20].mxu1 }
 0x2cf   : > { %v867_v22 = vmax.f32 %v863_v13, %v1855_v21  ;;  %v1858_v23 = vpop.f32.mrb[21].mxu1 }
 0x2d0   : > { %v866_v24 = vmax.f32 %v862_v15, %v1858_v23 }
 0x2d2   : > { %v1861_v25 = vpop.f32.mrb[22].mxu1 }
 0x2d3   : > { %v869_v26 = vmax.f32 %v865_v18, %v1861_v25  ;;  %v1864_v27 = vpop.f32.mrb[23].mxu1 }
 0x2d4   : > { %v868_v28 = vmax.f32 %v864_v20, %v1864_v27 }
 0x2d6   : > { %v1867_v29 = vpop.f32.mrb[24].mxu1 }
 0x2d7   : > { %v871_v30 = vmax.f32 %v867_v22, %v1867_v29  ;;  %v1870_v31 = vpop.f32.mrb[25].mxu1 }
 0x2d8   : > { %v870_v32 = vmax.f32 %v866_v24, %v1870_v31 }
 0x2da   : > { %v1873_v33 = vpop.f32.mrb[26].mxu1 }
 0x2db   : > { %v873_v34 = vmax.f32 %v869_v26, %v1873_v33  ;;  %v1876_v35 = vpop.f32.mrb[27].mxu1 }
 0x2dc   : > { %v872_v36 = vmax.f32 %v868_v28, %v1876_v35 }
 0x2de   : > { %v1879_v37 = vpop.f32.mrb[28].mxu1 }
 0x2df   : > { %v875_v38 = vmax.f32 %v871_v30, %v1879_v37  ;;  %v1882_v39 = vpop.f32.mrb[29].mxu1 }
 0x2e0   : > { %v874_v40 = vmax.f32 %v870_v32, %v1882_v39 }
 0x2e2   : > { %v878_v41 = vmax.f32 %v874_v40, %v875_v38  ;;  %v1885_v42 = vpop.f32.mrb[30].mxu1 }
 0x2e3   : > { %v877_v43 = vmax.f32 %v873_v34, %v1885_v42  ;;  %v1888_v44 = vpop.f32.mrb[31].mxu1 }
 0x2e4   : > { %v876_v45 = vmax.f32 %v872_v36, %v1888_v44 }
 0x2e6   : > { %v879_v46 = vmax.f32 %v876_v45, %v877_v43 }
 0x2e8   : > { %v880_v47 = vmax.f32 %v878_v41, %v879_v46 }
 0x2ea   : > { %v881_v53 = vrot.slane %v880_v47, 4 }
 0x2ec   : > { %v882_v55 = vmax.f32 %v880_v47, %v881_v53 }
 0x2ee   : > { %v883_v57 = vrot.slane %v882_v55, 2 }
 0x2f0   : > { %v884_v59 = vmax.f32 %v882_v55, %v883_v57 }
 0x2f2   : > { %v885_v61 = vrot.slane %v884_v59, 1 }
 0x2f4   : > { %v1891_v63 = vmax.f32 %v884_v59, %v885_v61 }
 0x2f6   : > { %v887_v1 = vsub.f32 %v1797_v49, %v1891_v63  ;;  %v888_v3 = vsub.f32 %v1795_v48, %v1891_v63  ;;  %v889_v5 = vsub.f32 %v1801_v51, %v1891_v63  ;;  %v890_v7 = vsub.f32 %v1799_v50, %v1891_v63 }
 0x2f7   : > { %v891_v9 = vsub.f32 %v1807_v54, %v1891_v63  ;;  %v892_v11 = vsub.f32 %v1803_v52, %v1891_v63  ;;  %v893_v13 = vsub.f32 %v1815_v58, %v1891_v63  ;;  %v894_v49 = vsub.f32 %v1811_v56, %v1891_v63 }
 0x2f8   : > { %v895_v48 = vsub.f32 %v1822_v62, %v1891_v63  ;;  %v896_v51 = vsub.f32 %v1819_v60, %v1891_v63  ;;  %v897_v50 = vsub.f32 %v1828_v2, %v1891_v63  ;;  %v898_v54 = vsub.f32 %v1825_v0, %v1891_v63 }
 0x2f9   : > { %v899_v52 = vsub.f32 %v1834_v6, %v1891_v63  ;;  %v900_v58 = vsub.f32 %v1831_v4, %v1891_v63  ;;  %v901_v56 = vsub.f32 %v1840_v10, %v1891_v63  ;;  %v902_v62 = vsub.f32 %v1837_v8, %v1891_v63 }
 0x2fa   : > { %v903_v60 = vsub.f32 %v1846_v14, %v1891_v63  ;;  %v904_v2 = vsub.f32 %v1843_v12, %v1891_v63  ;;  %v905_v0 = vsub.f32 %v1852_v19, %v1891_v63  ;;  %v906_v6 = vsub.f32 %v1849_v16, %v1891_v63 }
 0x2fb   : > { %v907_v4 = vsub.f32 %v1858_v23, %v1891_v63  ;;  %v908_v10 = vsub.f32 %v1855_v21, %v1891_v63  ;;  %v909_v8 = vsub.f32 %v1864_v27, %v1891_v63  ;;  %v910_v14 = vsub.f32 %v1861_v25, %v1891_v63 }
 0x2fc   : > { %v911_v12 = vsub.f32 %v1870_v31, %v1891_v63  ;;  %v912_v15 = vsub.f32 %v1867_v29, %v1891_v63  ;;  %v913_v16 = vsub.f32 %v1876_v35, %v1891_v63  ;;  %v914_v17 = vsub.f32 %v1873_v33, %v1891_v63 }
 0x2fd   : > { %v915_v18 = vsub.f32 %v1882_v39, %v1891_v63  ;;  %v916_v19 = vsub.f32 %v1879_v37, %v1891_v63  ;;  %v917_v20 = vsub.f32 %v1888_v44, %v1891_v63  ;;  %v918_v22 = vsub.f32 %v1885_v42, %v1891_v63 }
 0x2fe   : > { %v919_v23 = vmul.f32 1.442695, %v887_v1  ;;  %v921_v24 = vmul.f32 1.442695, %v888_v3  ;;  %v923_v26 = vmul.f32 1.442695, %v889_v5 }
 0x2ff   : > { %v925_v28 = vmul.f32 1.442695, %v890_v7  ;;  %v927_v30 = vmul.f32 1.442695, %v891_v9  ;;  %v929_v32 = vmul.f32 1.442695, %v892_v11 }
 0x300   : > { %1475 = vpow2.f32 %v919_v23  ;;  %v931_v34 = vmul.f32 1.442695, %v893_v13  ;;  %v933_v36 = vmul.f32 1.442695, %v894_v49  ;;  %v935_v38 = vmul.f32 1.442695, %v895_v48 }
 0x301   : > { %1477 = vpow2.f32 %v921_v24  ;;  %v937_v40 = vmul.f32 1.442695, %v896_v51  ;;  %v939_v41 = vmul.f32 1.442695, %v897_v50  ;;  %v941_v43 = vmul.f32 1.442695, %v898_v54 }
 0x302   : > { %1479 = vpow2.f32 %v923_v26  ;;  %v943_v45 = vmul.f32 1.442695, %v899_v52  ;;  %v945_v46 = vmul.f32 1.442695, %v900_v58  ;;  %v947_v53 = vmul.f32 1.442695, %v901_v56 }
 0x303   : > { %1481 = vpow2.f32 %v925_v28  ;;  %v949_v57 = vmul.f32 1.442695, %v902_v62  ;;  %v951_v61 = vmul.f32 1.442695, %v903_v60  ;;  %v953_v7 = vmul.f32 1.442695, %v904_v2 }
 0x304   : > { %1483 = vpow2.f32 %v927_v30  ;;  %v955_v11 = vmul.f32 1.442695, %v905_v0  ;;  %v957_v51 = vmul.f32 1.442695, %v906_v6  ;;  %v959_v54 = vmul.f32 1.442695, %v907_v4 }
 0x305   : > { %1485 = vpow2.f32 %v929_v32  ;;  %v961_v62 = vmul.f32 1.442695, %v908_v10  ;;  %v963_v2 = vmul.f32 1.442695, %v909_v8  ;;  %v965_v21 = vmul.f32 1.442695, %v910_v14 }
 0x306   : > { %1487 = vpow2.f32 %v931_v34  ;;  %v967_v27 = vmul.f32 1.442695, %v911_v12  ;;  %v969_v25 = vmul.f32 1.442695, %v912_v15  ;;  %v971_v31 = vmul.f32 1.442695, %v913_v16 }
 0x307   : > { %1489 = vpow2.f32 %v933_v36  ;;  %v973_v29 = vmul.f32 1.442695, %v914_v17  ;;  %v975_v35 = vmul.f32 1.442695, %v915_v18  ;;  %v977_v33 = vmul.f32 1.442695, %v916_v19 }
 0x308   : > { %1491 = vpow2.f32 %v935_v38  ;;  %v979_v34 = vmul.f32 1.442695, %v917_v20  ;;  %v981_v38 = vmul.f32 1.442695, %v918_v22 }
 0x309   : > { %1493 = vpow2.f32 %v937_v40 }
 0x30a   : > { %v1957_v47 = vpop.eup %1475  ;;  %1495 = vpow2.f32 %v939_v41 }
 0x30b   : > { %v1959_v55 = vpop.eup %1477  ;;  %1497 = vpow2.f32 %v941_v43 }
 0x30c   : > { %v1961_v59 = vpop.eup %1479  ;;  %1499 = vpow2.f32 %v943_v45  ;;  %v983_v1 = vadd.f32 %v1959_v55, %v1957_v47  ;;  %v1370_v3 = vpack.c.bf16 %v1959_v55, %v1957_v47 }
 0x30d   : > { %v1967_v5 = vpop.eup %1481  ;;  %1501 = vpow2.f32 %v945_v46 }
 0x30e   : > { %v1969_v9 = vpop.eup %1483  ;;  %1503 = vpow2.f32 %v947_v53  ;;  %v984_v13 = vadd.f32 %v1961_v59, %v983_v1  ;;  %v1374_v49 = vpack.c.bf16 %v1967_v5, %v1961_v59 }
 0x30f   : > { %v1974_v48 = vpop.eup %1485  ;;  %1505 = vpow2.f32 %v949_v57 }
 0x310   : > { %v1976_v50 = vpop.eup %1487  ;;  %1507 = vpow2.f32 %v951_v61  ;;  %v985_v52 = vadd.f32 %v1967_v5, %v984_v13  ;;  %v1378_v58 = vpack.c.bf16 %v1974_v48, %v1969_v9 }
 0x311   : > { %v1981_v56 = vpop.eup %1489  ;;  %1509 = vpow2.f32 %v953_v7 }
 0x312   : > { %v1986_v60 = vpop.eup %1491  ;;  %1511 = vpow2.f32 %v955_v11  ;;  %v986_v0 = vadd.f32 %v1969_v9, %v985_v52  ;;  %v1382_v6 = vpack.c.bf16 %v1981_v56, %v1976_v50 }
 0x313   : > { %v1994_v4 = vpop.eup %1493  ;;  %1513 = vpow2.f32 %v957_v51 }
 0x314   : > { %v1999_v10 = vpop.eup %1495  ;;  %1515 = vpow2.f32 %v959_v54  ;;  %v987_v8 = vadd.f32 %v1974_v48, %v986_v0  ;;  %v1386_v23 = vpack.c.bf16 %v1994_v4, %v1986_v60 }
 0x315   : > { %v2007_v24 = vpop.eup %1497  ;;  %1517 = vpow2.f32 %v961_v62 }
 0x316   : > { %v2012_v14 = vpop.eup %1499  ;;  %1519 = vpow2.f32 %v963_v2  ;;  %v988_v12 = vadd.f32 %v1976_v50, %v987_v8  ;;  %v1390_v26 = vpack.c.bf16 %v2007_v24, %v1999_v10 }
 0x317   : > { %v2020_v28 = vpop.eup %1501  ;;  %1521 = vpow2.f32 %v965_v21 }
 0x318   : > { %v2025_v15 = vpop.eup %1503  ;;  %1523 = vpow2.f32 %v967_v27  ;;  %v989_v16 = vadd.f32 %v1981_v56, %v988_v12  ;;  %v1394_v30 = vpack.c.bf16 %v2020_v28, %v2012_v14 }
 0x319   : > { %v2033_v32 = vpop.eup %1505  ;;  %1525 = vpow2.f32 %v969_v25 }
 0x31a   : > { %v1508_v17 = vpop.eup %1507  ;;  %1527 = vpow2.f32 %v971_v31  ;;  %v990_v39 = vadd.f32 %v1986_v60, %v989_v16  ;;  %v1398_v18 = vpack.c.bf16 %v2033_v32, %v2025_v15  ;;  %v1020_v60 = vld [vmem:[#allocation3] sm:$0xff] }
 0x31b   : > { %v1510_v36 = vpop.eup %1509  ;;  %1529 = vpow2.f32 %v973_v29 }
 0x31c   : > { %v1512_v40 = vpop.eup %1511  ;;  %1531 = vpow2.f32 %v975_v35  ;;  %v991_v37 = vadd.f32 %v1994_v4, %v990_v39  ;;  %v1368_v19 = vpack.c.bf16 %v1510_v36, %v1508_v17 }
 0x31d   : > { %v1514_v41 = vpop.eup %1513  ;;  %1533 = vpow2.f32 %v977_v33 }
 0x31e   : > { %v1516_v44 = vpop.eup %1515  ;;  %1535 = vpow2.f32 %v979_v34  ;;  %v992_v20 = vadd.f32 %v1999_v10, %v991_v37  ;;  %1369 = vmatprep.subr.bf16.mxu0 %v1368_v19  ;;  %v1372_v43 = vpack.c.bf16 %v1514_v41, %v1512_v40 }
 0x31f   : > { %v1518_v45 = vpop.eup %1517  ;;  %1537 = vpow2.f32 %v981_v38  ;;  %1371 = vmatpush3.bf16.msra.mxu0 %v1370_v3 }
 0x320   : > { %v1520_v42 = vpop.eup %1519  ;;  %v993_v63 = vadd.f32 %v2007_v24, %v992_v20  ;;  %1373 = vmatprep.subr.bf16.mxu0 %v1372_v43  ;;  %v1376_v22 = vpack.c.bf16 %v1518_v45, %v1516_v44 }
 0x321   : > { %v1522_v46 = vpop.eup %1521 }
 0x322   : > { %v1524_v53 = vpop.eup %1523  ;;  %v994_v57 = vadd.f32 %v2012_v14, %v993_v63  ;;  %v1380_v61 = vpack.c.bf16 %v1522_v46, %v1520_v42 }
 0x323   : > { %v1526_v1 = vpop.eup %1525  ;;  %1375 = vmatpush3.bf16.msra.mxu0 %v1374_v49 }
 0x324   : > { %v1528_v7 = vpop.eup %1527  ;;  %v995_v11 = vadd.f32 %v2020_v28, %v994_v57  ;;  %1377 = vmatprep.subr.bf16.mxu0 %v1376_v22  ;;  %v1384_v47 = vpack.c.bf16 %v1526_v1, %v1524_v53 }
 0x325   : > { %v1530_v55 = vpop.eup %1529 }
 0x326   : > { %v1532_v3 = vpop.eup %1531  ;;  %v996_v13 = vadd.f32 %v2025_v15, %v995_v11  ;;  %v1388_v51 = vpack.c.bf16 %v1530_v55, %v1528_v7 }
 0x327   : > { %v1534_v54 = vpop.eup %1533  ;;  %1379 = vmatpush3.bf16.msra.mxu0 %v1378_v58 }
 0x328   : > { %v1536_v52 = vpop.eup %1535  ;;  %v997_v62 = vadd.f32 %v2033_v32, %v996_v13  ;;  %1381 = vmatprep.subr.bf16.mxu0 %v1380_v61  ;;  %v1392_v59 = vpack.c.bf16 %v1534_v54, %v1532_v3 }
 0x329   : > { %v1538_v5 = vpop.eup %1537 }
 0x32a   : > { %v998_v49 = vadd.f32 %v1508_v17, %v997_v62  ;;  %v1396_v2 = vpack.c.bf16 %v1538_v5, %v1536_v52 }
 0x32b   : > { %1383 = vmatpush3.bf16.msra.mxu0 %v1382_v6 }
 0x32c   : > { %v999_v0 = vadd.f32 %v1510_v36, %v998_v49  ;;  %1385 = vmatprep.subr.bf16.mxu0 %v1384_v47 }
 0x32e   : > { %v1000_v21 = vadd.f32 %v1512_v40, %v999_v0 }
 0x32f   : > { %1387 = vmatpush3.bf16.msra.mxu0 %v1386_v23 }
 0x330   : > { %v1001_v9 = vadd.f32 %v1514_v41, %v1000_v21  ;;  %1389 = vmatprep.subr.bf16.mxu0 %v1388_v51 }
 0x332   : > { %v1002_v48 = vadd.f32 %v1516_v44, %v1001_v9 }
 0x333   : > { %1391 = vmatpush3.bf16.msra.mxu0 %v1390_v26 }
 0x334   : > { %v1003_v58 = vadd.f32 %v1518_v45, %v1002_v48  ;;  %1393 = vmatprep.subr.bf16.mxu0 %v1392_v59 }
 0x336   : > { %v1004_v27 = vadd.f32 %v1520_v42, %v1003_v58 }
 0x337   : > { %1395 = vmatpush3.bf16.msra.mxu0 %v1394_v30 }
 0x338   : > { %v1005_v50 = vadd.f32 %v1522_v46, %v1004_v27  ;;  %1397 = vmatprep.subr.bf16.mxu0 %v1396_v2 }
 0x33a   : > { %v1006_v56 = vadd.f32 %v1524_v53, %v1005_v50 }
 0x33b   : > { %1399 = vmatpush3.bf16.msra.mxu0 %v1398_v18 }
 0x33c   : > { %v1007_v6 = vadd.f32 %v1526_v1, %v1006_v56 }
 0x33e   : > { %v1008_v4 = vadd.f32 %v1528_v7, %v1007_v6  ;;  %1087 = vmatmul.mubr.f32.vlgmr.msra.gmra.mrb[2].mxu0 %v1020_v60 }
 0x340   : > { %v1009_v8 = vadd.f32 %v1530_v55, %v1008_v4 }
 0x342   : > { %v1010_v10 = vadd.f32 %v1532_v3, %v1009_v8 }
 0x344   : > { %v1011_v23 = vadd.f32 %v1534_v54, %v1010_v10 }
 0x346   : > { %v1012_v24 = vadd.f32 %v1536_v52, %v1011_v23 }
 0x348   : > { %v1013_v25 = vadd.f32 %v1538_v5, %v1012_v24 }
 0x34a   : > { %v1014_v31 = vrot.slane %v1013_v25, 4 }
 0x34c   : > { %v1015_v12 = vadd.f32 %v1014_v31, %v1013_v25 }
 0x34e   : > { %v1016_v14 = vrot.slane %v1015_v12, 2 }
 0x350   : > { %v1017_v26 = vadd.f32 %v1016_v14, %v1015_v12 }
 0x352   : > { %v1018_v28 = vrot.slane %v1017_v26, 1 }
 0x354   : > { %v1019_v29 = vadd.f32 %v1018_v28, %v1017_v26 }
 0x356   : > { %1539 = vrcp.f32 %v1019_v29 }
 0x360   : > { %v1540_v30 = vpop.eup %1539 }
 0x411   : > { %v1310_v15 = vpop.f32.mrb[2].mxu0 }
 0x412   : > { %v1311_v35 = vpop.f32.mrb[3].mxu0 }
 0x413   : > { %v1312_v16 = vadd.f32 %v1311_v35, %v1310_v15 }
 0x415   : > { %v1094_v32 = vmul.f32 %v1540_v30, %v1312_v16 }
 0x417   : > { %1095 = vst [vmem:[%s204_s23] sm:$0xff] %v1094_v32 }
 0x418   : > { %1554 = shalt.err (!%p1551_p7)
}
 0x419   : > { %s1555_s8 = scalar_lea.hbm %s2082_s11, 128  ;;  %s1559_s14 = scalar_lea.hbm %s2143_s4, 512 }
 0x41a   : > { %p1556_p9 = scmp.ne.s32.totalorder %s2082_s11, %s1555_s8  ;;  %p1560_p12 = scmp.lt.u32.totalorder %s2082_s11, %s2143_s4 }
 0x41b   : > { %p1561_p13 = scmp.lt.u32.totalorder %s1559_s14, %s1555_s8  ;;  %p1563_p1 = scmp.lt.u32.totalorder %s1555_s8, %s2082_s11 }
 0x41c   : > { %p1557_p10 = pnand %p1556_p9, %p1717_p3 }
 0x41d   : > { %p1562_p0 = por %p1561_p13, %p1560_p12 }
 0x41e   : > { %p1558_p11 = pneg %p1557_p10 }
 0x41f   : > { %p1564_p2 = por %p1563_p1, %p1562_p0 }
 0x421   : > { %p1565_p4 = pnand %p1564_p2, %p1558_p11 }
 0x423   : > { %1568 = shalt.err (!%p1565_p4)
}
 0x424   : > { %1400 = dma.vmem_to_hbm [thread:$0]  (%p1717_p3), %s2084_s5, 128, %s2082_s11, %s1097_s18  }
 0x425 PF: > { %p1406_p5 = scmp.ge.s32.totalorder %s1635_s22, 2  ;;  %s1124_s6 = sand.u32 1, %s1607_s15  }
 0x426   : > { %s1125_s10 = scalar_lea.sflag [#allocation5], %s1124_s6 }
 0x427   : > { %p1403_p6 = pnand %p1406_p5, %p1726_p8 }
 0x429   : > { %1602 = dma.done.wait (!%p1403_p6), %s1125_s10, 128  }
 0x42a   : > { %1604 = vsyncadd (!%p1403_p6), %s1125_s10, 4294967168  ;;  %s17_s22 = sadd.s32 1, %s1635_s22   ;;  %s2146_s15 = smov %s1611_s16 }
 0x42b   : > { %p14_p7 = scmp.ge.s32.totalorder %s17_s22, 6   ;;  %s2147_s16 = smov %s1615_s17 }
 0x42c   : > { %s2148_s17 = smov %s1735_s7  ;;  %s2149_s18 = smov %s1627_s20 }
 0x42d   : > { %s2150_s19 = smov %s1631_s21  ;;  %s2151_s20 = smov %s2154_s25 }
 0x42e   : > { %s2152_s21 = smov %s2158_s26  ;;  %16 = sbr.rel (!%p14_p7) target bundleno = 5 (0x5), region = 76 }
 0x435   :  { %1130 = vsyncpa [#allocation5], 1 }
 0x436   :  { %1132 = vsyncpa [#allocation5 + $0x1], 1 }

</bundles_post_ra>
